<compile_context>
chip_gen: v6e
topology: v6e:2x2x1
jax: 0.10.0
libtpu: 0.0.40
codegen_flags: <defaults>
</compile_context>

<pallas_src>
import numpy as np
import jax
import jax.numpy as jnp
from jax.experimental import pallas as pl
from jax.experimental.pallas import tpu as pltpu


def _round_up(x, m):
    return ((x + m - 1) // m) * m


def _gen_kernel(noise_ref, ids_ref, w1_ref, b1_ref, w2_ref, b2_ref,
                w3_ref, b3_ref, out_ref, x1_ref, h_ref):
    """Grid = (batch tiles ["parallel"], output-feature tiles ["arbitrary"])."""
    j = pl.program_id(1)

    # Hidden state is recomputed only once per batch tile (j == 0) and reused
    # across all P tiles via the h VMEM scratch.
    @pl.when(j == 0)
    def _compute_hidden():
        ids = ids_ref[...]                                   # (TB, L) int32
        tb, L = ids.shape
        dim_pad = noise_ref.shape[1]
        n_tags_pad = x1_ref.shape[1] - dim_pad

        # --- tag counts (TB, n_tags_pad), unrolled over the short static tag axis
        lane_iota = jax.lax.broadcasted_iota(jnp.int32, (tb, n_tags_pad), 1)
        counts = jnp.zeros((tb, n_tags_pad), jnp.float32)
        for l in range(L):                                   # small, static -> unrolled
            counts = counts + (ids[:, l:l + 1] == lane_iota).astype(jnp.float32)

        # --- single K = dim_pad + n_tags_pad layer-1 operand: [noise | counts] bf16
        x1_ref[:, :dim_pad] = noise_ref[...]                 # noise already bf16
        x1_ref[:, dim_pad:] = counts.astype(jnp.bfloat16)    # counts exact in bf16 (L<=256)

        # --- layer 1 (merged K=256 GEMM) + ReLU -------------------------------
        h = jnp.dot(x1_ref[...], w1_ref[...],
                    preferred_element_type=jnp.float32) + b1_ref[...]
        h = jnp.maximum(h, 0.0)

        # --- layer 2 + ReLU ----------------------------------------------------
        h = jnp.dot(h.astype(jnp.bfloat16), w2_ref[...],
                    preferred_element_type=jnp.float32) + b2_ref[...]
        h = jnp.maximum(h, 0.0)
        h_ref[...] = h.astype(jnp.bfloat16)

    # --- layer 3 (one TN-wide output-feature tile) + fused tanh epilogue -------
    y = jnp.dot(h_ref[...], w3_ref[...],
                preferred_element_type=jnp.float32) + b3_ref[...]
    out_ref[...] = jnp.tanh(y)                               # lane-dense f32 store


def simple_generative_model(noise, tag_ids, kparams, img_shape, *,
                            tile_b=256, tile_n=128):
    """noise: (B, dim) f32, tag_ids: (B, L) int32 -> (B, *img_shape) f32."""
    B, dim = noise.shape
    L = tag_ids.shape[1]
    P = int(np.prod(img_shape))
    assert L <= 256, "counts must stay exactly representable in bf16"
    assert tile_b % 16 == 0 and tile_n % 128 == 0

    w1, b1, w2, b2, w3, b3 = (kparams[k] for k in ("w1", "b1", "w2", "b2", "w3", "b3"))
    k1_pad, dim_pad = w1.shape            # k1_pad = dim_pad + n_tags_pad
    p_pad = w3.shape[1]

    tn = min(tile_n, p_pad)
    assert p_pad % tn == 0
    tb = min(tile_b, _round_up(B, 16))    # multiple of 16 (bf16 sublane packing)
    b_pad = _round_up(B, tb)

    # Pad batch / feature dims; cast noise to bf16 (halves its DMA bytes).
    noise_p = jnp.pad(noise, ((0, b_pad - B), (0, dim_pad - dim))).astype(jnp.bfloat16)
    ids = jnp.pad(tag_ids.astype(jnp.int32), ((0, b_pad - B), (0, 0)))  # pad rows -> tag 0

    grid = (b_pad // tb, p_pad // tn)

    # --- explicit VMEM budget (portable to v7x 64 MiB physical / 32 MiB scoped) ---
    resident = (w1.size + w2.size) * 2 + (b1.size + b2.size) * 4   # Buffered(1) weights
    per_step = 2 * (dim_pad * tn * 2 + tn * 4                      # w3 / b3 tiles (2-buf)
                    + tb * dim_pad * 2 + tb * L * 4                # noise / ids tiles
                    + tb * tn * 4)                                 # out tile
    scratch = tb * k1_pad * 2 + tb * dim_pad * 2                   # x1 + h slabs
    vmem_budget = resident + per_step + scratch
    vmem_limit = int(min(32 * 1024 * 1024, max(2 * 1024 * 1024, 2 * vmem_budget)))

    flops = 2 * b_pad * (k1_pad * dim_pad + dim_pad * dim_pad + dim_pad * p_pad)
    bytes_accessed = (noise_p.size * 2 + ids.size * 4
                      + w1.size * 2 + w2.size * 2 + w3.size * 2
                      + (b1.size + b2.size + b3.size) * 4
                      + b_pad * p_pad * 4)

    const = lambda i, j: (0, 0)           # grid-invariant (resident) operands
    out = pl.pallas_call(
        _gen_kernel,
        out_shape=jax.ShapeDtypeStruct((b_pad, p_pad), jnp.float32),
        grid_spec=pltpu.PrefetchScalarGridSpec(
            num_scalar_prefetch=0,
            grid=grid,
            in_specs=[
                pl.BlockSpec((tb, dim_pad), lambda i, j: (i, 0)),       # noise (bf16)
                pl.BlockSpec((tb, L), lambda i, j: (i, 0)),             # tag ids
                pl.BlockSpec(w1.shape, const, pipeline_mode=pl.Buffered(1)),  # stacked W1 (bf16)
                pl.BlockSpec(b1.shape, const, pipeline_mode=pl.Buffered(1)),
                pl.BlockSpec(w2.shape, const, pipeline_mode=pl.Buffered(1)),
                pl.BlockSpec(b2.shape, const, pipeline_mode=pl.Buffered(1)),
                pl.BlockSpec((dim_pad, tn), lambda i, j: (0, j)),       # W3 tile
                pl.BlockSpec((1, tn), lambda i, j: (0, j)),             # b3 tile
            ],
            out_specs=pl.BlockSpec((tb, tn), lambda i, j: (i, j)),
            scratch_shapes=[
                pltpu.VMEM((tb, k1_pad), jnp.bfloat16),                 # [noise | counts] slab
                pltpu.VMEM((tb, dim_pad), jnp.bfloat16),                # hidden state h
            ],
        ),
        compiler_params=pltpu.CompilerParams(
            dimension_semantics=("parallel", "arbitrary"),
            vmem_limit_bytes=vmem_limit,
        ),
        cost_estimate=pl.CostEstimate(flops=flops,
                                      transcendentals=b_pad * p_pad,
                                      bytes_accessed=bytes_accessed),
    )(noise_p, ids, w1, b1, w2, b2, w3, b3)

    return out[:B, :P].reshape(B, *img_shape)
    # TODO(synk): above a few hundred tags, switch the counts GEMM to a
    # scalar-prefetched row gather of the folded W1 rows (num_scalar_prefetch=1).


def make_params(key, n_tags, dim, img_shape):
    """Reference-precision (f32, unfolded, unpadded) parameters matching PyTorch."""
    P = int(np.prod(img_shape))
    ks = jax.random.split(key, 4)

    # Embedding(n_tags, dim, padding_idx=0): row 0 forced to zero.
    emb = jax.random.normal(ks[0], (n_tags, dim), jnp.float32) * 0.1
    emb = emb.at[0].set(0.0)

    def lin(k, fan_in, fan_out):
        bound = 1.0 / np.sqrt(fan_in)
        kw, kb = jax.random.split(k)
        w = jax.random.uniform(kw, (fan_in, fan_out), jnp.float32, -bound, bound)
        b = jax.random.uniform(kb, (1, fan_out), jnp.float32, -bound, bound)
        return w, b                                          # stored as torch_weight.T

    w1, b1 = lin(ks[1], 2 * dim, dim)
    w2, b2 = lin(ks[2], dim, dim)
    w3, b3 = lin(ks[3], dim, P)
    return dict(emb=emb, w1=w1, b1=b1, w2=w2, b2=b2, w3=w3, b3=b3)


def prepare_kernel_params(params, n_tags, dim, img_shape, *, lane=128):
    """Fold emb @ W1_tag, stack with W1_noise into one K=(dim_pad+n_tags_pad) weight,
    zero-pad all feature dims to lane multiples, cast matmul weights to bf16."""
    P = int(np.prod(img_shape))
    dim_pad = _round_up(dim, lane)
    p_pad = _round_up(P, lane)
    n_tags_pad = _round_up(n_tags, lane)

    def pad2(x, rows, cols):
        return jnp.pad(x, ((0, rows - x.shape[0]), (0, cols - x.shape[1])))

    # Re-zero padding row 0 defensively (required for the counts @ (emb@W1t) identity).
    emb = params["emb"].at[0].set(0.0)
    w1 = params["w1"]
    w1n, w1t = w1[:dim], w1[dim:]
    w1t_folded = emb @ w1t                                   # (n_tags, dim), exact folding

    # Stacked layer-1 weight: rows [0, dim_pad) multiply noise, the rest multiply counts.
    w1_stacked = jnp.concatenate([pad2(w1n, dim_pad, dim_pad),
                                  pad2(w1t_folded, n_tags_pad, dim_pad)], axis=0)

    return dict(
        w1=w1_stacked.astype(jnp.bfloat16),
        b1=pad2(params["b1"], 1, dim_pad),
        w2=pad2(params["w2"], dim_pad, dim_pad).astype(jnp.bfloat16),
        b2=pad2(params["b2"], 1, dim_pad),
        w3=pad2(params["w3"], dim_pad, p_pad).astype(jnp.bfloat16),
        b3=pad2(params["b3"], 1, p_pad),
    )


def reference_forward(noise, tag_ids, params, img_shape):
    """Pure-JAX f32 reference mirroring the PyTorch module exactly."""
    emb, w1, b1, w2, b2, w3, b3 = (params[k] for k in
                                   ("emb", "w1", "b1", "w2", "b2", "w3", "b3"))
    tag_emb = jnp.take(emb, tag_ids, axis=0).sum(axis=1)
    x = jnp.concatenate([noise, tag_emb], axis=-1)
    h = jnp.maximum(x @ w1 + b1, 0.0)
    h = jnp.maximum(h @ w2 + b2, 0.0)
    y = jnp.tanh(h @ w3 + b3)
    return y.reshape(noise.shape[0], *img_shape)


if __name__ == "__main__":
    # Small shapes consistent with the module; B=32 with tile_b=16 exercises a
    # genuine 2-step "parallel" batch grid axis (weights stay resident across steps).
    B, L = 32, 8                # batch, tag sequence length
    n_tags, dim = 64, 32
    img_shape = (1, 8, 8)       # (C, H, W) -> prod = 64

    key = jax.random.PRNGKey(0)
    k_noise, k_ids, k_params = jax.random.split(key, 3)

    noise = jax.random.normal(k_noise, (B, dim), jnp.float32)
    tag_ids = jax.random.randint(k_ids, (B, L), 0, n_tags, jnp.int32)  # 0 = padding idx
    params = make_params(k_params, n_tags, dim, img_shape)
    kparams = prepare_kernel_params(params, n_tags, dim, img_shape)

    out = simple_generative_model(noise, tag_ids, kparams, img_shape, tile_b=16)
    out = jax.block_until_ready(out)

    ref = reference_forward(noise, tag_ids, params, img_shape)
    assert out.shape == (B, *img_shape), out.shape
    # bf16 matmul operands (f32 accumulation) => loosened tolerance vs pure-f32 ref.
    np.testing.assert_allclose(np.asarray(out), np.asarray(ref), atol=2e-2, rtol=2e-2)

    print("KERNEL_OK")
</pallas_src>

<mosaic_0001>
module attributes {stable_mosaic.version = 11 : i64} {
  func.func @_gen_kernel(%arg0: i32, %arg1: i32, %arg2: memref<16x128xbf16, #tpu.memory_space<vmem>>, %arg3: memref<16x8xi32, #tpu.memory_space<vmem>>, %arg4: memref<256x128xbf16, #tpu.memory_space<vmem>>, %arg5: memref<1x128xf32, #tpu.memory_space<vmem>>, %arg6: memref<128x128xbf16, #tpu.memory_space<vmem>>, %arg7: memref<1x128xf32, #tpu.memory_space<vmem>>, %arg8: memref<128x128xbf16, #tpu.memory_space<vmem>>, %arg9: memref<1x128xf32, #tpu.memory_space<vmem>>, %arg10: memref<16x128xf32, #tpu.memory_space<vmem>>, %arg11: memref<16x256xbf16, #tpu.memory_space<vmem>>, %arg12: memref<16x128xbf16, #tpu.memory_space<vmem>>) attributes {dimension_semantics = [#tpu.dimension_semantics<parallel>, #tpu.dimension_semantics<arbitrary>], iteration_bounds = array<i64: 2, 1>, scalar_prefetch = 0 : i64, scratch_operands = 2 : i64, tpu.core_type = #tpu.core_type<tc>, window_params = [{transform_indices = @transform_0, window_bounds = array<i64: 16, 128>}, {transform_indices = @transform_1, window_bounds = array<i64: 16, 8>}, {pipeline_mode = #tpu.pipeline_mode<synchronous>, transform_indices = @transform_2, window_bounds = array<i64: 256, 128>}, {pipeline_mode = #tpu.pipeline_mode<synchronous>, transform_indices = @transform_3, window_bounds = array<i64: 1, 128>}, {pipeline_mode = #tpu.pipeline_mode<synchronous>, transform_indices = @transform_4, window_bounds = array<i64: 128, 128>}, {pipeline_mode = #tpu.pipeline_mode<synchronous>, transform_indices = @transform_5, window_bounds = array<i64: 1, 128>}, {transform_indices = @transform_6, window_bounds = array<i64: 128, 128>}, {transform_indices = @transform_7, window_bounds = array<i64: 1, 128>}, {transform_indices = @transform_8, window_bounds = array<i64: 16, 128>}]} {
    %c0_i32 = arith.constant 0 : i32
    %0 = arith.cmpi eq, %arg1, %c0_i32 : i32
    %1 = arith.extui %0 : i1 to i32
    %c0_i32_0 = arith.constant 0 : i32
    %2 = arith.cmpi ne, %1, %c0_i32_0 : i32
    scf.if %2 {
      %c0_8 = arith.constant 0 : index
      %c0_9 = arith.constant 0 : index
      %11 = vector.load %arg3[%c0_8, %c0_9] : memref<16x8xi32, #tpu.memory_space<vmem>>, vector<16x8xi32>
      %12 = tpu.iota {dimensions = array<i32: 1>} : vector<16x128xi32>
      %cst_10 = arith.constant 0.000000e+00 : f32
      %13 = vector.broadcast %cst_10 : f32 to vector<16x128xf32>
      %14 = vector.extract_strided_slice %11 {offsets = [0, 0], sizes = [16, 1], strides = [1, 1]} : vector<16x8xi32> to vector<16x1xi32>
      %15 = vector.broadcast %14 : vector<16x1xi32> to vector<16x128xi32>
      %16 = arith.cmpi eq, %15, %12 : vector<16x128xi32>
      %17 = arith.extui %16 : vector<16x128xi1> to vector<16x128xi32>
      %18 = arith.sitofp %17 : vector<16x128xi32> to vector<16x128xf32>
      %19 = arith.addf %13, %18 : vector<16x128xf32>
      %20 = vector.extract_strided_slice %11 {offsets = [0, 1], sizes = [16, 1], strides = [1, 1]} : vector<16x8xi32> to vector<16x1xi32>
      %21 = vector.broadcast %20 : vector<16x1xi32> to vector<16x128xi32>
      %22 = arith.cmpi eq, %21, %12 : vector<16x128xi32>
      %23 = arith.extui %22 : vector<16x128xi1> to vector<16x128xi32>
      %24 = arith.sitofp %23 : vector<16x128xi32> to vector<16x128xf32>
      %25 = arith.addf %19, %24 : vector<16x128xf32>
      %26 = vector.extract_strided_slice %11 {offsets = [0, 2], sizes = [16, 1], strides = [1, 1]} : vector<16x8xi32> to vector<16x1xi32>
      %27 = vector.broadcast %26 : vector<16x1xi32> to vector<16x128xi32>
      %28 = arith.cmpi eq, %27, %12 : vector<16x128xi32>
      %29 = arith.extui %28 : vector<16x128xi1> to vector<16x128xi32>
      %30 = arith.sitofp %29 : vector<16x128xi32> to vector<16x128xf32>
      %31 = arith.addf %25, %30 : vector<16x128xf32>
      %32 = vector.extract_strided_slice %11 {offsets = [0, 3], sizes = [16, 1], strides = [1, 1]} : vector<16x8xi32> to vector<16x1xi32>
      %33 = vector.broadcast %32 : vector<16x1xi32> to vector<16x128xi32>
      %34 = arith.cmpi eq, %33, %12 : vector<16x128xi32>
      %35 = arith.extui %34 : vector<16x128xi1> to vector<16x128xi32>
      %36 = arith.sitofp %35 : vector<16x128xi32> to vector<16x128xf32>
      %37 = arith.addf %31, %36 : vector<16x128xf32>
      %38 = vector.extract_strided_slice %11 {offsets = [0, 4], sizes = [16, 1], strides = [1, 1]} : vector<16x8xi32> to vector<16x1xi32>
      %39 = vector.broadcast %38 : vector<16x1xi32> to vector<16x128xi32>
      %40 = arith.cmpi eq, %39, %12 : vector<16x128xi32>
      %41 = arith.extui %40 : vector<16x128xi1> to vector<16x128xi32>
      %42 = arith.sitofp %41 : vector<16x128xi32> to vector<16x128xf32>
      %43 = arith.addf %37, %42 : vector<16x128xf32>
      %44 = vector.extract_strided_slice %11 {offsets = [0, 5], sizes = [16, 1], strides = [1, 1]} : vector<16x8xi32> to vector<16x1xi32>
      %45 = vector.broadcast %44 : vector<16x1xi32> to vector<16x128xi32>
      %46 = arith.cmpi eq, %45, %12 : vector<16x128xi32>
      %47 = arith.extui %46 : vector<16x128xi1> to vector<16x128xi32>
      %48 = arith.sitofp %47 : vector<16x128xi32> to vector<16x128xf32>
      %49 = arith.addf %43, %48 : vector<16x128xf32>
      %50 = vector.extract_strided_slice %11 {offsets = [0, 6], sizes = [16, 1], strides = [1, 1]} : vector<16x8xi32> to vector<16x1xi32>
      %51 = vector.broadcast %50 : vector<16x1xi32> to vector<16x128xi32>
      %52 = arith.cmpi eq, %51, %12 : vector<16x128xi32>
      %53 = arith.extui %52 : vector<16x128xi1> to vector<16x128xi32>
      %54 = arith.sitofp %53 : vector<16x128xi32> to vector<16x128xf32>
      %55 = arith.addf %49, %54 : vector<16x128xf32>
      %56 = vector.extract_strided_slice %11 {offsets = [0, 7], sizes = [16, 1], strides = [1, 1]} : vector<16x8xi32> to vector<16x1xi32>
      %57 = vector.broadcast %56 : vector<16x1xi32> to vector<16x128xi32>
      %58 = arith.cmpi eq, %57, %12 : vector<16x128xi32>
      %59 = arith.extui %58 : vector<16x128xi1> to vector<16x128xi32>
      %60 = arith.sitofp %59 : vector<16x128xi32> to vector<16x128xf32>
      %61 = arith.addf %55, %60 : vector<16x128xf32>
      %c0_11 = arith.constant 0 : index
      %c0_12 = arith.constant 0 : index
      %62 = vector.load %arg2[%c0_11, %c0_12] : memref<16x128xbf16, #tpu.memory_space<vmem>>, vector<16x128xbf16>
      %c0_13 = arith.constant 0 : index
      %c0_14 = arith.constant 0 : index
      %63 = vector.load %arg11[%c0_13, %c0_14] : memref<16x256xbf16, #tpu.memory_space<vmem>>, vector<16x128xbf16>
      tpu.vector_store %arg11[%c0_13, %c0_14], %62 {strides = array<i32>} : memref<16x256xbf16, #tpu.memory_space<vmem>>, vector<16x128xbf16>,
      %64 = arith.truncf %61 : vector<16x128xf32> to vector<16x128xbf16>
      %c0_15 = arith.constant 0 : index
      %c128 = arith.constant 128 : index
      %65 = vector.load %arg11[%c0_15, %c128] : memref<16x256xbf16, #tpu.memory_space<vmem>>, vector<16x128xbf16>
      tpu.vector_store %arg11[%c0_15, %c128], %64 {strides = array<i32>} : memref<16x256xbf16, #tpu.memory_space<vmem>>, vector<16x128xbf16>,
      %c0_16 = arith.constant 0 : index
      %c0_17 = arith.constant 0 : index
      %66 = vector.load %arg11[%c0_16, %c0_17] : memref<16x256xbf16, #tpu.memory_space<vmem>>, vector<16x256xbf16>
      %c0_18 = arith.constant 0 : index
      %c0_19 = arith.constant 0 : index
      %67 = vector.load %arg4[%c0_18, %c0_19] : memref<256x128xbf16, #tpu.memory_space<vmem>>, vector<256x128xbf16>
      %cst_20 = arith.constant dense<0.000000e+00> : vector<16x128xf32>
      %68 = tpu.matmul %66, %67, %cst_20 {dimension_numbers = #tpu.dot_dimension_numbers<[1], [0], [0], [1], [0, 0, 1, 1], [], []>} : vector<16x256xbf16>, vector<256x128xbf16>, vector<16x128xf32> -> vector<16x128xf32>
      %c0_21 = arith.constant 0 : index
      %c0_22 = arith.constant 0 : index
      %69 = vector.load %arg5[%c0_21, %c0_22] : memref<1x128xf32, #tpu.memory_space<vmem>>, vector<1x128xf32>
      %70 = vector.broadcast %69 : vector<1x128xf32> to vector<16x128xf32>
      %71 = arith.addf %68, %70 : vector<16x128xf32>
      %cst_23 = arith.constant 0.000000e+00 : f32
      %72 = vector.broadcast %cst_23 : f32 to vector<16x128xf32>
      %73 = arith.maximumf %71, %72 : vector<16x128xf32>
      %74 = arith.truncf %73 : vector<16x128xf32> to vector<16x128xbf16>
      %c0_24 = arith.constant 0 : index
      %c0_25 = arith.constant 0 : index
      %75 = vector.load %arg6[%c0_24, %c0_25] : memref<128x128xbf16, #tpu.memory_space<vmem>>, vector<128x128xbf16>
      %cst_26 = arith.constant dense<0.000000e+00> : vector<16x128xf32>
      %76 = tpu.matmul %74, %75, %cst_26 {dimension_numbers = #tpu.dot_dimension_numbers<[1], [0], [0], [1], [0, 0, 1, 1], [], []>} : vector<16x128xbf16>, vector<128x128xbf16>, vector<16x128xf32> -> vector<16x128xf32>
      %c0_27 = arith.constant 0 : index
      %c0_28 = arith.constant 0 : index
      %77 = vector.load %arg7[%c0_27, %c0_28] : memref<1x128xf32, #tpu.memory_space<vmem>>, vector<1x128xf32>
      %78 = vector.broadcast %77 : vector<1x128xf32> to vector<16x128xf32>
      %79 = arith.addf %76, %78 : vector<16x128xf32>
      %cst_29 = arith.constant 0.000000e+00 : f32
      %80 = vector.broadcast %cst_29 : f32 to vector<16x128xf32>
      %81 = arith.maximumf %79, %80 : vector<16x128xf32>
      %82 = arith.truncf %81 : vector<16x128xf32> to vector<16x128xbf16>
      %c0_30 = arith.constant 0 : index
      %c0_31 = arith.constant 0 : index
      %83 = vector.load %arg12[%c0_30, %c0_31] : memref<16x128xbf16, #tpu.memory_space<vmem>>, vector<16x128xbf16>
      tpu.vector_store %arg12[%c0_30, %c0_31], %82 {strides = array<i32>} : memref<16x128xbf16, #tpu.memory_space<vmem>>, vector<16x128xbf16>,
    } else {
    }
    %c0 = arith.constant 0 : index
    %c0_1 = arith.constant 0 : index
    %3 = vector.load %arg12[%c0, %c0_1] : memref<16x128xbf16, #tpu.memory_space<vmem>>, vector<16x128xbf16>
    %c0_2 = arith.constant 0 : index
    %c0_3 = arith.constant 0 : index
    %4 = vector.load %arg8[%c0_2, %c0_3] : memref<128x128xbf16, #tpu.memory_space<vmem>>, vector<128x128xbf16>
    %cst = arith.constant dense<0.000000e+00> : vector<16x128xf32>
    %5 = tpu.matmul %3, %4, %cst {dimension_numbers = #tpu.dot_dimension_numbers<[1], [0], [0], [1], [0, 0, 1, 1], [], []>} : vector<16x128xbf16>, vector<128x128xbf16>, vector<16x128xf32> -> vector<16x128xf32>
    %c0_4 = arith.constant 0 : index
    %c0_5 = arith.constant 0 : index
    %6 = vector.load %arg9[%c0_4, %c0_5] : memref<1x128xf32, #tpu.memory_space<vmem>>, vector<1x128xf32>
    %7 = vector.broadcast %6 : vector<1x128xf32> to vector<16x128xf32>
    %8 = arith.addf %5, %7 : vector<16x128xf32>
    %9 = math.tanh %8 : vector<16x128xf32>
    %c0_6 = arith.constant 0 : index
    %c0_7 = arith.constant 0 : index
    %10 = vector.load %arg10[%c0_6, %c0_7] : memref<16x128xf32, #tpu.memory_space<vmem>>, vector<16x128xf32>
    tpu.vector_store %arg10[%c0_6, %c0_7], %9 {strides = array<i32>} : memref<16x128xf32, #tpu.memory_space<vmem>>, vector<16x128xf32>,
    return
  }
  func.func @transform_0(%arg0: i32, %arg1: i32) -> (i32, i32) {
    %c0_i32 = arith.constant 0 : i32
    %c0_i32_0 = arith.constant 0 : i32
    return %arg0, %c0_i32 : i32, i32
  }
  func.func @transform_1(%arg0: i32, %arg1: i32) -> (i32, i32) {
    %c0_i32 = arith.constant 0 : i32
    %c0_i32_0 = arith.constant 0 : i32
    return %arg0, %c0_i32 : i32, i32
  }
  func.func @transform_2(%arg0: i32, %arg1: i32) -> (i32, i32) {
    %c0_i32 = arith.constant 0 : i32
    %c0_i32_0 = arith.constant 0 : i32
    %c0_i32_1 = arith.constant 0 : i32
    return %c0_i32, %c0_i32_0 : i32, i32
  }
  func.func @transform_3(%arg0: i32, %arg1: i32) -> (i32, i32) {
    %c0_i32 = arith.constant 0 : i32
    %c0_i32_0 = arith.constant 0 : i32
    %c0_i32_1 = arith.constant 0 : i32
    return %c0_i32, %c0_i32_0 : i32, i32
  }
  func.func @transform_4(%arg0: i32, %arg1: i32) -> (i32, i32) {
    %c0_i32 = arith.constant 0 : i32
    %c0_i32_0 = arith.constant 0 : i32
    %c0_i32_1 = arith.constant 0 : i32
    return %c0_i32, %c0_i32_0 : i32, i32
  }
  func.func @transform_5(%arg0: i32, %arg1: i32) -> (i32, i32) {
    %c0_i32 = arith.constant 0 : i32
    %c0_i32_0 = arith.constant 0 : i32
    %c0_i32_1 = arith.constant 0 : i32
    return %c0_i32, %c0_i32_0 : i32, i32
  }
  func.func @transform_6(%arg0: i32, %arg1: i32) -> (i32, i32) {
    %c0_i32 = arith.constant 0 : i32
    %c0_i32_0 = arith.constant 0 : i32
    return %c0_i32, %arg1 : i32, i32
  }
  func.func @transform_7(%arg0: i32, %arg1: i32) -> (i32, i32) {
    %c0_i32 = arith.constant 0 : i32
    %c0_i32_0 = arith.constant 0 : i32
    return %c0_i32, %arg1 : i32, i32
  }
  func.func @transform_8(%arg0: i32, %arg1: i32) -> (i32, i32) {
    %c0_i32 = arith.constant 0 : i32
    return %arg0, %arg1 : i32, i32
  }
}

</mosaic_0001>

<bundles_post_ra>
// kernel: tpu_custom_call.1
= control target key start
LH: loop header
LB: loop body
LE: loop exit
PB: predicated region body
PF: predicated region fallthrough
CT: control target
= control target key end

     0   :  { %13 = vsyncpa [#allocation5], 0  ;;  %s1887_s0 = inlined_call_operand.vmem [shape: bf16[32,128], index: 0, kind: input, shape index: {}]   ;;  %s1888_s1 = inlined_call_operand.vmem [shape: s32[32,8], index: 1, kind: input, shape index: {}]   ;;  %s1889_s2 = inlined_call_operand.hbm [shape: bf16[256,128], index: 2, kind: input, shape index: {}]   ;;  %s1890_s3 = inlined_call_operand.vmem [shape: f32[1,128], index: 3, kind: input, shape index: {}]   ;;  %s1891_s4 = inlined_call_operand.hbm [shape: bf16[128,128], index: 4, kind: input, shape index: {}]   ;;  %s1892_s5 = inlined_call_operand.vmem [shape: f32[1,128], index: 5, kind: input, shape index: {}]   ;;  %s1893_s6 = inlined_call_operand.hbm [shape: bf16[128,128], index: 6, kind: input, shape index: {}]   ;;  %s1894_s7 = inlined_call_operand.vmem [shape: f32[1,128], index: 7, kind: input, shape index: {}]   ;;  %s1895_s8 = inlined_call_operand.hbm [shape: f32[32,128], index: 8, kind: output, shape index: {}]  }
   0x1   :  { %14 = vsyncpa [#allocation8], 0 }
   0x2   :  { %15 = vsyncpa [#allocation6], 0 }
   0x3   :  { %17 = vsyncpa [#allocation6 + $0x1], 0  ;;  %s1676_s27 = smov 0   ;;  %s1678_s28 = smov 0  }
   0x4   :  { %s1680_s29 = smov 0   ;;  %s1682_s30 = smov 0  }
   0x5   :  { %s1684_s9 = smov 0   ;;  %s1686_s10 = smov 0  }
   0x6 LB: > { %s1126_s11 = sadd.s32 4294967295, %s1611_s10   ;;  %s1127_s12 = sadd.s32 4294967294, %s1611_s10   ;;  %s1611_s10 = sphi %s1686_s10, %s23_s10   ;;  %s1607_s9 = sphi %s1684_s9, %s1906_s9   ;;  %s1603_s30 = sphi %s1682_s30, %s1905_s30   ;;  %s1599_s29 = sphi %s1680_s29, %s1904_s29   ;;  %s1595_s28 = sphi %s1678_s28, %s1903_s28   ;;  %s1591_s27 = sphi %s1676_s27, %s1902_s27  }
   0x7   : > { %s35_s13 = sadd.s32 1, %s1607_s9  ;;  %s232_s14 = sadd.s32 1, %s1599_s29 }
   0x8   : > { %p37_p0 = scmp.ge.s32.totalorder %s35_s13, 2  ;;  %p242_p1 = scmp.ne.s32.totalorder %s1599_s29, %s1595_s28 }
   0x9   : > { %p243_p2 = scmp.eq.s32.totalorder %s1126_s11, 1  ;;  %p248_p3 = scmp.ne.s32.totalorder %s1595_s28, %s1591_s27 }
   0xa   : > { %s1908_s13 = smov (%p37_p0, %s35_s13), 0  ;;  %p249_p5 = scmp.eq.s32.totalorder %s1127_s12, 1 }
   0xb   : > { %p1716_p4 = por %p243_p2, %p242_p1  ;;  %s227_s16 = ssub.s32 %s1607_s9, %s1908_s13 }
   0xc   : > { %p1128_p6 = scmp.ge.s32.totalorder %s1611_s10, 1  ;;  %p230_p7 = scmp.eq.s32.totalorder %s227_s16, 0 }
   0xd   : > { %p1723_p8 = por %p249_p5, %p248_p3  ;;  %p256_p9 = scmp.lt.s32.totalorder %s1611_s10, 3 }
   0xe   : > { %s1729_s18 = scalar_select %p230_p7, %s1599_s29, %s232_s14  }
   0xf   : > { %s1897_s17 = scalar_select %p1723_p8, 1, 0 }
  0x10   : > { %p1731_p10 = pnand %p1128_p6, %p256_p9  ;;  %p1735_p11 = scmp.eq.s32.totalorder %s1126_s11, 0 }
  0x11   : > { %s1613_s21 = smov [#allocation7]   ;;  %s1614_s24 = smov [#allocation4]  }
  0x12   : > { %p1310_p12 = pneg %p1731_p10  ;;  %s284_s22 = sshll.u32 %s1613_s21, 4  ;;  %s285_s22 = int_to_ptr.vmem [resolvable:$true] %s284_s22 }
  0x13   : > { %s268_s25 = sshll.u32 %s1614_s24, 4  ;;  %s1460_s26 = scalar_lea.vmem %s285_s22, 1024  ;;  %s269_s25 = int_to_ptr.vmem [resolvable:$true] %s268_s25 }
  0x14   : > { %p1743_p13 = pnand %p1735_p11, %p1310_p12  ;;  %p1461_p1 = scmp.ne.s32.totalorder %s285_s22, %s1460_s26 }
  0x15   : > { %p1468_p5 = scmp.lt.s32.totalorder %s285_s22, %s285_s22  ;;  %p1469_p6 = scmp.lt.s32.totalorder %s1460_s26, %s1460_s26 }
  0x16   : > { %p1451_p0 = pneg %p1743_p13 }
  0x17   : > { %p1470_p7 = por %p1469_p6, %p1468_p5 }
  0x18   : > { %p1463_p2 = pnand %p1461_p1, %p1451_p0 }
  0x1a   : > { %p1464_p3 = pneg %p1463_p2 }
  0x1c   : > { %p1471_p9 = pnand %p1470_p7, %p1464_p3 }
  0x1e   : > { %1474 = shalt.err (!%p1471_p9)
}
  0x1f   : > { %s1615_s11 = smov 64   ;;  %s1616_s12 = smov 4  }
  0x20   : > { %1316 = dma.hbm_to_vmem [thread:$0]  (!%p1743_p13), %s1891_s4, 1024, %s285_s22, [#allocation8], %s1615_s11, %s1615_s11, %s1616_s12  }
  0x21   : > { %s1486_s21 = scalar_lea.vmem %s269_s25, 2048  ;;  %p1494_p8 = scmp.lt.s32.totalorder %s269_s25, %s269_s25 }
  0x22   : > { %p1487_p12 = scmp.ne.s32.totalorder %s269_s25, %s1486_s21  ;;  %p1495_p5 = scmp.lt.s32.totalorder %s1486_s21, %s1486_s21 }
  0x24   : > { %p1489_p1 = pnand %p1487_p12, %p1451_p0  ;;  %p1496_p3 = por %p1495_p5, %p1494_p8 }
  0x26   : > { %p1490_p2 = pneg %p1489_p1 }
  0x28   : > { %p1497_p6 = pnand %p1496_p3, %p1490_p2 }
  0x2a   : > { %1500 = shalt.err (!%p1497_p6)
}
  0x2b   : > { %1313 = dma.hbm_to_vmem [thread:$0]  (!%p1743_p13), %s1889_s2, 2048, %s269_s25, [#allocation5], %s1615_s11, %s1615_s11, %s1616_s12  }
  0x2c   : > { %s1617_s22 = smov [#allocation9]  }
  0x2d   : > { %s302_s14 = sshll.u32 %s1617_s22, 4  ;;  %s303_s14 = int_to_ptr.vmem [resolvable:$true] %s302_s14 }
  0x2e   : > { %s1512_s16 = scalar_lea.vmem %s303_s14, 1024  ;;  %p1520_p1 = scmp.lt.s32.totalorder %s303_s14, %s303_s14 }
  0x2f   : > { %p1513_p7 = scmp.ne.s32.totalorder %s303_s14, %s1512_s16  ;;  %p1521_p8 = scmp.lt.s32.totalorder %s1512_s16, %s1512_s16 }
  0x31   : > { %p1515_p9 = pnand %p1513_p7, %p1451_p0  ;;  %p1522_p2 = por %p1521_p8, %p1520_p1 }
  0x33   : > { %p1516_p12 = pneg %p1515_p9 }
  0x35   : > { %p1523_p5 = pnand %p1522_p2, %p1516_p12 }
  0x37   : > { %1526 = shalt.err (!%p1523_p5)
}
  0x38   : > { %1319 = dma.hbm_to_vmem [thread:$0]  (!%p1743_p13), %s1893_s6, 1024, %s303_s14, [#allocation8], %s1615_s11, %s1615_s11, %s1616_s12  }
  0x39   : > { %342 = sbr.rel (%p1731_p10) target bundleno = 898 (0x382), region = 52 }
  0x3e   : > { %1578 = dma.done.wait (%p1735_p11), [#allocation5], 2048  }
  0x3f   : > { %1580 = vsyncadd (%p1735_p11), [#allocation5], 4294965248 }
  0x40   : > { %1582 = dma.done.wait (%p1735_p11), [#allocation8], 2048  }
  0x41   : > { %1584 = vsyncadd (%p1735_p11), [#allocation8], 4294965248  ;;  %s1139_s23 = sshll.u32 %s1603_s30, 1  ;;  %v1618_v0 = vmov 1   ;;  %v1619_v1 = vmov 0   ;;  %v1620_v2 = vmov 0.0   ;;  %v415_v38 = vlaneseq }
  0x42   : > { %1397 = vset.pattern.permute.xlu1 %v1618_v0  ;;  %1396 = vset.pattern.permute.xlu0 %v1619_v1  ;;  %p393_p13 = scmp.lt.s32.totalorder %s1139_s23, 3  ;;  %v1621_v7 = vmov 2   ;;  %v1622_v8 = vmov 3   ;;  %v1623_v9 = vmov 4   ;;  %v1624_v10 = vmov 5   ;;  %v1409_v11 = vld [vmem:[#allocation4 + $0x78] sm:$0xff]  }
  0x43   : > { %1256 = vmatprep.subr.bf16.mxu1 %v1620_v2  ;;  %v1410_v12 = vld [vmem:[#allocation4 + $0x38] sm:$0xff]   ;;  %1216 = vmatprep.subr.bf16.mxu0 %v1409_v11  ;;  %v1625_v13 = vmov 6   ;;  %v1411_v14 = vld [vmem:[#allocation4 + $0x70] sm:$0xff]   ;;  %v1413_v16 = vld [vmem:[#allocation4 + $0x68] sm:$0xff]   ;;  %v1626_v18 = vmov 7   ;;  %v416_v40 = vand.u32 127, %v415_v38 }
  0x44   : > { %s1910_s23 = smov (!%p393_p13, %s1139_s23), 3  ;;  %1217 = vmatpush3.bf16.msra.mxu0 %v1410_v12  ;;  %v1412_v15 = vld [vmem:[#allocation4 + $0x30] sm:$0xff]   ;;  %v1414_v17 = vld [vmem:[#allocation4 + $0x28] sm:$0xff]   ;;  %v1415_v19 = vld [vmem:[#allocation4 + $0x60] sm:$0xff]   ;;  %s389_s11 = sand.u32 1, %s1595_s28  }
  0x45   : > { %s1140_s19 = sshll.u32 %s1910_s23, 2  ;;  %s1142_s25 = sshll.u32 %s1910_s23, 3  ;;  %1218 = vmatprep.subr.bf16.mxu0 %v1411_v14  ;;  %v1416_v20 = vld [vmem:[#allocation4 + $0x20] sm:$0xff]   ;;  %v1417_v21 = vld [vmem:[#allocation4 + $0x58] sm:$0xff]   ;;  %v1419_v23 = vld [vmem:[#allocation4 + $0x50] sm:$0xff]  }
  0x46   : > { %s396_s26 = scalar_lea.vmem %s1887_s0, %s1140_s19  ;;  %s402_s14 = scalar_lea.vmem %s1888_s1, %s1142_s25  ;;  %v1418_v22 = vld [vmem:[#allocation4 + $0x18] sm:$0xff]   ;;  %v1420_v24 = vld [vmem:[#allocation4 + $0x10] sm:$0xff]   ;;  %v1421_v25 = vld [vmem:[#allocation4 + $0x48] sm:$0xff]  }
  0x47   : > { %v413_v3 = vld [vmem:[%s402_s14] sm:$0xff]  ;;  %v414_v6 = vld [vmem:[%s402_s14 + $0x8] sm:$0xff]  ;;  %v1423_v27 = vld [vmem:[#allocation4 + $0x40] sm:$0xff]   ;;  %s1138_s12 = sshll.u32 %s389_s11, 4  ;;  %s1842_s24 = scalar_lea.sflag [#allocation6], %s389_s11 }
  0x48   : > { %v529_v4 = vld [vmem:[%s396_s26] sm:$0xf]  ;;  %v530_v5 = vld [vmem:[%s396_s26 + $0x4] sm:$0xf]  ;;  %432 = vperm.xlu1 %1397, %v413_v3   ;;  %418 = vperm.xlu0 %1396, %v413_v3   ;;  %v1424_v28 = vld [vmem:[#allocation4] sm:$0xff]   ;;  %s1210_s26 = sshll.u32 %s1603_s30, 8 }
  0x49   : > { %531 = vst [vmem:[#allocation2] sm:$0xf] %v529_v4  ;;  %532 = vst [vmem:[#allocation2 + $0x8] sm:$0xf] %v530_v5  ;;  %1219 = vmatpush3.bf16.msra.mxu0 %v1412_v15  ;;  %v1422_v26 = vld [vmem:[#allocation4 + $0x8] sm:$0xff]   ;;  %v1428_v29 = vld [vmem:[#allocation7 + $0x38] sm:$0xff]   ;;  %s1838_s21 = scalar_lea.hbm %s1895_s8, %s1210_s26 }
  0x4a   : > { %1220 = vmatprep.subr.bf16.mxu0 %v1413_v16  ;;  %1257 = vmatpush3.bf16.msra.mxu1 %v1428_v29  ;;  %v1429_v30 = vld [vmem:[#allocation7 + $0x30] sm:$0xff]   ;;  %v1430_v31 = vld [vmem:[#allocation7 + $0x28] sm:$0xff]   ;;  %v1431_v32 = vld [vmem:[#allocation7 + $0x20] sm:$0xff]   ;;  %s391_s22 = scalar_lea.vmem [#allocation10], %s1138_s12  ;;  %s1628_s30 = smov [#allocation10]  }
  0x4b   : > { %1258 = vmatprep.subr.bf16.mxu1 %v1620_v2  ;;  %s997_s20 = sshll.u32 %s391_s22, 4  ;;  %s1531_s19 = sshll.u32 %s1628_s30, 4  ;;  %s1840_s20 = int_to_ptr.vmem [resolvable:$true] %s997_s20  ;;  %s1532_s19 = int_to_ptr.vmem [resolvable:$false] %s1531_s19 }
  0x4c   : > { %435 = vperm.xlu1 %1397, %v414_v6   ;;  %421 = vperm.xlu0 %1396, %v414_v6   ;;  %s1527_s23 = scalar_lea.vmem %s1840_s20, 256  ;;  %s1533_s25 = scalar_lea.vmem %s1532_s19, 512 }
  0x4d   : > { %1221 = vmatpush3.bf16.msra.mxu0 %v1414_v17  ;;  %p1528_p10 = scmp.ne.s32.totalorder %s1840_s20, %s1527_s23  ;;  %p1534_p3 = scmp.lt.s32.totalorder %s1840_s20, %s1532_s19 }
  0x4e   : > { %1222 = vmatprep.subr.bf16.mxu0 %v1415_v19  ;;  %1259 = vmatpush3.bf16.msra.mxu1 %v1429_v30  ;;  %p1535_p6 = scmp.lt.s32.totalorder %s1533_s25, %s1527_s23 }
  0x4f   : > { %1260 = vmatprep.subr.bf16.mxu1 %v1620_v2  ;;  %p1529_p11 = pnand %p1528_p10, %p1716_p4 }
  0x50   : > { %1399 = vset.pattern.permute.xlu1 %v1621_v7  ;;  %1398 = vset.pattern.permute.xlu0 %v1621_v7  ;;  %p1536_p7 = por %p1535_p6, %p1534_p3 }
  0x51   : > { %449 = vperm.xlu1 %1399, %v414_v6   ;;  %446 = vperm.xlu0 %1398, %v413_v3   ;;  %p1530_p0 = pneg %p1529_p11 }
  0x52   : > { %1223 = vmatpush3.bf16.msra.mxu0 %v1416_v20  ;;  %1261 = vmatpush3.bf16.msra.mxu1 %v1430_v31  ;;  %v1425_v20 = vld [vmem:[#allocation2] ss:$8 sps:$4 sm:$0xff]  }
  0x53   : > { %1224 = vmatprep.subr.bf16.mxu0 %v1417_v21  ;;  %1262 = vmatprep.subr.bf16.mxu1 %v1620_v2  ;;  %p1537_p9 = pnand %p1536_p7, %p1530_p0 }
  0x55   : > { %1400 = vset.pattern.permute.xlu1 %v1622_v8  ;;  %1401 = vset.pattern.permute.xlu0 %v1622_v8 }
  0x56   : > { %460 = vperm.xlu1 %1400, %v413_v3   ;;  %463 = vperm.xlu0 %1401, %v414_v6  }
  0x57   : > { %1225 = vmatpush3.bf16.msra.mxu0 %v1418_v22  ;;  %1263 = vmatpush3.bf16.msra.mxu1 %v1431_v32  ;;  %v1432_v22 = vld [vmem:[#allocation7 + $0x18] sm:$0xff]   ;;  %v1161_v32 = vld [vmem:[%s1890_s3] ss:$0 sm:$0xff] }
  0x58   : > { %1226 = vmatprep.subr.bf16.mxu0 %v1419_v23  ;;  %1264 = vmatprep.subr.bf16.mxu1 %v1620_v2  ;;  %v1433_v23 = vld [vmem:[#allocation7 + $0x10] sm:$0xff]  }
  0x5a   : > { %1402 = vset.pattern.permute.xlu1 %v1623_v9  ;;  %1403 = vset.pattern.permute.xlu0 %v1624_v10 }
  0x5b   : > { %474 = vperm.xlu1 %1402, %v413_v3   ;;  %488 = vperm.xlu0 %1403, %v413_v3  }
  0x5c   : > { %1227 = vmatpush3.bf16.msra.mxu0 %v1420_v24  ;;  %1265 = vmatpush3.bf16.msra.mxu1 %v1432_v22  ;;  %v1434_v24 = vld [vmem:[#allocation7 + $0x8] sm:$0xff]  }
  0x5d   : > { %1228 = vmatprep.subr.bf16.mxu0 %v1421_v25  ;;  %1266 = vmatprep.subr.bf16.mxu1 %v1620_v2  ;;  %v1435_v25 = vld [vmem:[#allocation7] sm:$0xff]  }
  0x5f   : > { %477 = vperm.xlu1 %1402, %v414_v6   ;;  %1406 = vset.pattern.permute.xlu0 %v1625_v13 }
  0x60   : > { %505 = vperm.xlu0 %1406, %v414_v6   ;;  %1229 = vmatpush3.bf16.msra.mxu0 %v1422_v26  ;;  %v1436_v26 = vld [vmem:[#allocation9 + $0x38] sm:$0xff]  }
  0x61   : > { %1230 = vmatprep.subr.bf16.mxu0 %v1423_v27  ;;  %1267 = vmatpush3.bf16.msra.mxu1 %v1433_v23  ;;  %v1437_v27 = vld [vmem:[#allocation9 + $0x30] sm:$0xff]  }
  0x62   : > { %1268 = vmatprep.subr.bf16.mxu1 %v1620_v2 }
  0x63   : > { %1404 = vset.pattern.permute.xlu1 %v1624_v10 }
  0x64   : > { %491 = vperm.xlu1 %1404, %v414_v6   ;;  %1408 = vset.pattern.permute.xlu0 %v1626_v18 }
  0x65   : > { %1231 = vmatpush3.bf16.msra.mxu0 %v1424_v28  ;;  %1269 = vmatpush3.bf16.msra.mxu1 %v1434_v24  ;;  %v1438_v28 = vld [vmem:[#allocation9 + $0x28] sm:$0xff]  }
  0x66   : > { %1276 = vmatprep.subr.bf16.mxu0 %v1620_v2  ;;  %1270 = vmatprep.subr.bf16.mxu1 %v1620_v2 }
  0x68   : > { %1405 = vset.pattern.permute.xlu1 %v1625_v13 }
  0x69   : > { %502 = vperm.xlu1 %1405, %v413_v3   ;;  %1271 = vmatpush3.bf16.msra.mxu1 %v1435_v25 }
  0x6d   : > { %1407 = vset.pattern.permute.xlu1 %v1626_v18 }
  0x6e   : > { %516 = vperm.xlu1 %1407, %v413_v3  }
  0x72   : > { %519 = vperm.xlu1 %1407, %v414_v6  }
  0xc3   : > { %v433_v33 = vpop.permute.xlu1 %432  ;;  %v419_v35 = vpop.permute.xlu0 %418 }
  0xc4   : > { %vm437_vm0 = vcmp.eq.s32.totalorder %v433_v33, %v416_v40  ;;  %vm423_vm1 = vcmp.eq.s32.totalorder %v419_v35, %v416_v40 }
  0xc5   : > { %v1145_v44 = vsel %vm437_vm0, 1.0, %v1620_v2  ;;  %v1143_v45 = vsel %vm423_vm1, 1.0, %v1620_v2  ;;  %vm1627_vm0 = vmmov 0  }
  0xc6   : > { %v443_v48 = vadd.f32 %v1145_v44, %v1143_v45  ;;  %1272 = vmatprep.mubr.msk.bf16.mxu1 %vm1627_vm0, %v1620_v2  ;;  %v1442_v44 = vld [vmem:[#allocation9 + $0x8] sm:$0xff]   ;;  %v1443_v45 = vld [vmem:[#allocation9] sm:$0xff]  }
  0xc7   : > { %v436_v34 = vpop.permute.xlu1 %435  ;;  %v422_v37 = vpop.permute.xlu0 %421 }
  0xc8   : > { %vm438_vm3 = vcmp.eq.s32.totalorder %v436_v34, %v416_v40  ;;  %vm424_vm4 = vcmp.eq.s32.totalorder %v422_v37, %v416_v40 }
  0xc9   : > { %v1146_v49 = vsel %vm438_vm3, 1.0, %v1620_v2  ;;  %v1144_v50 = vsel %vm424_vm4, 1.0, %v1620_v2 }
  0xca   : > { %v444_v57 = vadd.f32 %v1146_v49, %v1144_v50 }
  0xcc   : > { %v450_v36 = vpop.permute.xlu1 %449  ;;  %v447_v41 = vpop.permute.xlu0 %446 }
  0xcd   : > { %vm451_vm2 = vcmp.eq.s32.totalorder %v447_v41, %v416_v40  ;;  %vm452_vm6 = vcmp.eq.s32.totalorder %v450_v36, %v416_v40  ;;  %v1439_v41 = vld [vmem:[#allocation9 + $0x20] sm:$0xff]  }
  0xce   : > { %v1147_v47 = vsel %vm451_vm2, 1.0, %v1620_v2  ;;  %v1148_v55 = vsel %vm452_vm6, 1.0, %v1620_v2 }
  0xcf   : > { %v457_v54 = vadd.f32 %v1147_v47, %v443_v48  ;;  %v458_v60 = vadd.f32 %v1148_v55, %v444_v57 }
  0xd1   : > { %v461_v39 = vpop.permute.xlu1 %460  ;;  %v464_v46 = vpop.permute.xlu0 %463 }
  0xd2   : > { %vm465_vm5 = vcmp.eq.s32.totalorder %v461_v39, %v416_v40  ;;  %vm466_vm8 = vcmp.eq.s32.totalorder %v464_v46, %v416_v40  ;;  %v1180_v46 = vld [vmem:[%s1892_s5] ss:$0 sm:$0xff] }
  0xd3   : > { %v1149_v51 = vsel %vm465_vm5, 1.0, %v1620_v2  ;;  %v1150_v59 = vsel %vm466_vm8, 1.0, %v1620_v2 }
  0xd4   : > { %v471_v58 = vadd.f32 %v1149_v51, %v457_v54  ;;  %v472_v3 = vadd.f32 %v1150_v59, %v458_v60 }
  0xd6   : > { %v475_v42 = vpop.permute.xlu1 %474  ;;  %v489_v52 = vpop.permute.xlu0 %488 }
  0xd7   : > { %vm479_vm7 = vcmp.eq.s32.totalorder %v475_v42, %v416_v40  ;;  %vm493_vm9 = vcmp.eq.s32.totalorder %v489_v52, %v416_v40  ;;  %v1440_v42 = vld [vmem:[#allocation9 + $0x18] sm:$0xff]  }
  0xd8   : > { %v1151_v56 = vsel %vm479_vm7, 1.0, %v1620_v2  ;;  %v1153_v63 = vsel %vm493_vm9, 1.0, %v1620_v2 }
  0xd9   : > { %v485_v61 = vadd.f32 %v1151_v56, %v471_v58 }
  0xda   : > { %v478_v43 = vpop.permute.xlu1 %477 }
  0xdb   : > { %vm480_vm10 = vcmp.eq.s32.totalorder %v478_v43, %v416_v40  ;;  %v506_v1 = vpop.permute.xlu0 %505  ;;  %v499_v6 = vadd.f32 %v1153_v63, %v485_v61  ;;  %v1441_v43 = vld [vmem:[#allocation9 + $0x10] sm:$0xff]  }
  0xdc   : > { %v1152_v0 = vsel %vm480_vm10, 1.0, %v1620_v2  ;;  %vm508_vm13 = vcmp.eq.s32.totalorder %v506_v1, %v416_v40 }
  0xdd   : > { %v486_v7 = vadd.f32 %v1152_v0, %v472_v3  ;;  %v1156_v11 = vsel %vm508_vm13, 1.0, %v1620_v2 }
  0xdf   : > { %v492_v53 = vpop.permute.xlu1 %491 }
  0xe0   : > { %vm494_vm11 = vcmp.eq.s32.totalorder %v492_v53, %v416_v40 }
  0xe1   : > { %v1154_v4 = vsel %vm494_vm11, 1.0, %v1620_v2 }
  0xe2   : > { %v500_v9 = vadd.f32 %v1154_v4, %v486_v7 }
  0xe4   : > { %v503_v62 = vpop.permute.xlu1 %502  ;;  %v514_v15 = vadd.f32 %v1156_v11, %v500_v9 }
  0xe5   : > { %vm507_vm12 = vcmp.eq.s32.totalorder %v503_v62, %v416_v40 }
  0xe6   : > { %v1155_v5 = vsel %vm507_vm12, 1.0, %v1620_v2 }
  0xe7   : > { %v513_v10 = vadd.f32 %v1155_v5, %v499_v6 }
  0xe9   : > { %v517_v8 = vpop.permute.xlu1 %516 }
  0xea   : > { %vm521_vm14 = vcmp.eq.s32.totalorder %v517_v8, %v416_v40 }
  0xeb   : > { %v1157_v12 = vsel %vm521_vm14, 1.0, %v1620_v2 }
  0xec   : > { %v527_v13 = vadd.f32 %v1157_v12, %v513_v10 }
  0xed   : > { %v520_v14 = vpop.permute.xlu1 %519 }
  0xee   : > { %v1206_v16 = vpack.c.bf16 %v527_v13, %v527_v13  ;;  %vm522_vm15 = vcmp.eq.s32.totalorder %v520_v14, %v416_v40 }
  0xef   : > { %v1158_v17 = vsel %vm522_vm15, 1.0, %v1620_v2 }
  0xf0   : > { %541 = vst [vmem:[#allocation2 + $0x4] sm:$0xf] %v1206_v16  ;;  %v528_v18 = vadd.f32 %v1158_v17, %v514_v15 }
  0xf2   : > { %v1207_v19 = vpack.c.bf16 %v528_v18, %v528_v18 }
  0xf4   : > { %542 = vst [vmem:[#allocation2 + $0xc] sm:$0xf] %v1207_v19 }
  0xfb   : > { %v1427_v21 = vld [vmem:[#allocation2 + $0x4] ss:$8 sps:$4 sm:$0xff]  }
  0xfc   : > { %722 = vmatprep.mubr.bf16.mxu0 %v1427_v21 }
  0xfd   : > { %723 = vmatmul.mubr.bf16.vlgmr.msra.gmra.mxu0 %v1425_v20 }
  0xfe   : > { %1292 = vmatprep.mubr.msk.bf16.mxu0 %vm1627_vm0, %v1620_v2  ;;  %1277 = vmatpush3.bf16.msra.mxu0 %v1436_v26 }
  0xff   : > { %1278 = vmatprep.subr.bf16.mxu0 %v1620_v2 }
 0x102   : > { %1279 = vmatpush3.bf16.msra.mxu0 %v1437_v27 }
 0x103   : > { %1280 = vmatprep.subr.bf16.mxu0 %v1620_v2 }
 0x106   : > { %1281 = vmatpush3.bf16.msra.mxu0 %v1438_v28 }
 0x107   : > { %1282 = vmatprep.subr.bf16.mxu0 %v1620_v2 }
 0x10a   : > { %1283 = vmatpush3.bf16.msra.mxu0 %v1439_v41 }
 0x10b   : > { %1284 = vmatprep.subr.bf16.mxu0 %v1620_v2 }
 0x10e   : > { %1285 = vmatpush3.bf16.msra.mxu0 %v1440_v42 }
 0x10f   : > { %1286 = vmatprep.subr.bf16.mxu0 %v1620_v2 }
 0x112   : > { %1287 = vmatpush3.bf16.msra.mxu0 %v1441_v43 }
 0x113   : > { %1288 = vmatprep.subr.bf16.mxu0 %v1620_v2 }
 0x116   : > { %1289 = vmatpush3.bf16.msra.mxu0 %v1442_v44 }
 0x117   : > { %1290 = vmatprep.subr.bf16.mxu0 %v1620_v2  ;;  %v1191_v2 = vld [vmem:[%s1894_s7] ss:$0 sm:$0xff] }
 0x11a   : > { %1291 = vmatpush3.bf16.msra.mxu0 %v1443_v45 }
 0x1bd   : > { %v1232_v29 = vpop.f32.mrf.mxu0 }
 0x1bf   : > { %v1233_v30 = vpop.f32.mrf.mxu0 }
 0x1c0   : > { %v1234_v31 = vadd.f32 %v1233_v30, %v1232_v29 }
 0x1c1   : > { %v1235_v33 = vpop.f32.mrf.mxu0 }
 0x1c2   : > { %v725_v35 = vadd.f32 %v1234_v31, %v1161_v32 }
 0x1c3   : > { %v1236_v34 = vpop.f32.mrf.mxu0 }
 0x1c4   : > { %v1237_v36 = vadd.f32 %v1236_v34, %v1235_v33  ;;  %v731_v38 = vmax.f32 %v725_v35, 0.0 }
 0x1c6   : > { %v728_v37 = vadd.f32 %v1237_v36, %v1161_v32 }
 0x1c8   : > { %v732_v39 = vmax.f32 %v728_v37, 0.0 }
 0x1ca   : > { %v733_v40 = vpack.c.bf16 %v732_v39, %v731_v38 }
 0x1cc   : > { %1273 = vmatmul.mubr.bf16.vlgmr.msra.gmra.mxu1 %v733_v40 }
 0x28c   : > { %v839_v47 = vpop.f32.mrf.mxu1 }
 0x28d   : > { %v840_v49 = vadd.f32 %v1180_v46, %v839_v47 }
 0x28e   : > { %v1274_v48 = vpop.f32.mrf.mxu1 }
 0x28f   : > { %v846_v53 = vmax.f32 %v840_v49, 0.0 }
 0x290   : > { %v842_v50 = vpop.f32.mrf.mxu1 }
 0x291   : > { %v843_v51 = vadd.f32 %v1180_v46, %v842_v50 }
 0x292   : > { %v1275_v52 = vpop.f32.mrf.mxu1 }
 0x293   : > { %v847_v54 = vmax.f32 %v843_v51, 0.0 }
 0x295   : > { %v1214_v55 = vpack.c.bf16 %v847_v54, %v846_v53 }
 0x297   : > { %1215 = vst [vmem:[#allocation3] sm:$0xff] %v1214_v55  }
 0x29e   : > { %v1444_v56 = vld [vmem:[#allocation3] sm:$0xff]  }
 0x29f   : > { %1293 = vmatmul.mubr.bf16.vlgmr.msra.gmra.mxu0 %v1444_v56 }
 0x35f   : > { %v971_v57 = vpop.f32.mrf.mxu0 }
 0x360   : > { %v972_v58 = vadd.f32 %v1191_v2, %v971_v57 }
 0x361   : > { %v1294_v59 = vpop.f32.mrf.mxu0 }
 0x362   : > { %1445 = vtanh.f32 %v972_v58 }
 0x363   : > { %v974_v60 = vpop.f32.mrf.mxu0 }
 0x364   : > { %v975_v61 = vadd.f32 %v1191_v2, %v974_v60 }
 0x365   : > { %v1295_v62 = vpop.f32.mrf.mxu0 }
 0x366   : > { %1447 = vtanh.f32 %v975_v61 }
 0x36f   : > { %v1446_v63 = vpop.eup %1445 }
 0x370   : > { %980 = vst [vmem:[%s391_s22] sm:$0xff] %v1446_v63 }
 0x373   : > { %v1448_v0 = vpop.eup %1447 }
 0x374   : > { %981 = vst [vmem:[%s391_s22 + $0x8] sm:$0xff] %v1448_v0 }
 0x375   : > { %1540 = shalt.err (!%p1537_p9)
}
 0x376   : > { %s1541_s11 = scalar_lea.hbm %s1838_s21, 256  ;;  %s1545_s22 = scalar_lea.hbm %s1895_s8, 512 }
 0x377   : > { %p1542_p12 = scmp.ne.s32.totalorder %s1838_s21, %s1541_s11  ;;  %p1546_p2 = scmp.lt.s32.totalorder %s1838_s21, %s1895_s8 }
 0x378   : > { %p1547_p5 = scmp.lt.s32.totalorder %s1545_s22, %s1541_s11 }
 0x379   : > { %p1543_p1 = pnand %p1542_p12, %p1716_p4 }
 0x37a   : > { %p1548_p13 = por %p1547_p5, %p1546_p2 }
 0x37b   : > { %p1544_p8 = pneg %p1543_p1 }
 0x37d   : > { %p1549_p10 = pnand %p1548_p13, %p1544_p8 }
 0x37f   : > { %1552 = shalt.err (!%p1549_p10)
}
 0x380   : > { %s1629_s23 = smov 128   ;;  %s1630_s30 = smov 8  }
 0x381   : > { %1308 = dma.vmem_to_hbm [thread:$0]  (%p1716_p4), %s1840_s20, 256, %s1838_s21, %s1842_s24, %s1629_s23, %s1629_s23, %s1630_s30  }
 0x382 PF: > { %p1330_p11 = scmp.ge.s32.totalorder %s1611_s10, 2  ;;  %s1012_s19 = sand.u32 1, %s1591_s27  }
 0x383   : > { %p1901_p0 = scmp.ne.s32.totalorder %s1897_s17, 0  ;;  %s1013_s25 = scalar_lea.sflag [#allocation6], %s1012_s19 }
 0x385   : > { %p1321_p3 = pnand %p1330_p11, %p1901_p0 }
 0x387   : > { %p1322_p6 = pneg %p1321_p3 }
 0x389   : > { %1586 = dma.done.wait (%p1322_p6), %s1013_s25, 256  }
 0x38a   : > { %1588 = vsyncadd (%p1322_p6), %s1013_s25, 4294967040  ;;  %s23_s10 = sadd.s32 1, %s1611_s10   ;;  %s1902_s27 = smov %s1595_s28 }
 0x38b   : > { %p20_p7 = scmp.ge.s32.totalorder %s23_s10, 4   ;;  %s1903_s28 = smov %s1599_s29 }
 0x38c   : > { %s1904_s29 = smov %s1729_s18  ;;  %s1905_s30 = smov %s1607_s9 }
 0x38d   : > { %s1906_s9 = smov %s1908_s13  ;;  %22 = sbr.rel (!%p20_p7) target bundleno = 6 (0x6), region = 111 }
 0x392   :  { %1018 = vsyncpa [#allocation5], 1 }
 0x393   :  { %1020 = vsyncpa [#allocation5 + $0x1], 1 }
 0x394   :  { %1021 = vsyncpa [#allocation8], 1 }
 0x395   :  { %1022 = vsyncpa [#allocation6], 1 }
 0x396   :  { %1024 = vsyncpa [#allocation6 + $0x1], 1 }

</bundles_post_ra>
